<compile_context>
chip_gen: v7x
topology: tpu7x:2x2x1
jax: 0.10.0
libtpu: 0.0.40
codegen_flags: <defaults>
</compile_context>

<pallas_src>
import functools

import jax
import jax.numpy as jnp
from jax.experimental import pallas as pl
from jax.experimental.pallas import tpu as pltpu


def _vae_kernel(x_ref, w1_ref, b1_ref, w2_ref, b2_ref,
                w3_ref, b3_ref, w4_ref, b4_ref,
                noise_ref,
                out_ref, musig_ref):
    latent_size = musig_ref.shape[1] // 2

    # ----- encoder -----
    x = x_ref[...].astype(jnp.bfloat16)                        # (B, C*H*W) bf16 LHS
    h1 = jnp.dot(x, w1_ref[...], preferred_element_type=jnp.float32) + b1_ref[...]
    h1 = jnp.maximum(h1, 0.0)                                  # ReLU (f32 VPU)

    # Single fused (F1 -> 2L) matmul; torch.chunk(dim=1) == static slices below.
    mid = jnp.dot(h1.astype(jnp.bfloat16), w2_ref[...],
                  preferred_element_type=jnp.float32) + b2_ref[...]
    mid = jnp.maximum(mid, 0.0)                                # ReLU
    mu = mid[:, :latent_size]
    sigma = mid[:, latent_size:]

    # ----- reparameterization -----
    latent = mu + sigma * noise_ref[...]                       # f32

    # ----- decoder -----
    h2 = jnp.dot(latent.astype(jnp.bfloat16), w3_ref[...],
                 preferred_element_type=jnp.float32) + b3_ref[...]
    h2 = jnp.maximum(h2, 0.0)                                  # ReLU
    logits = jnp.dot(h2.astype(jnp.bfloat16), w4_ref[...],
                     preferred_element_type=jnp.float32) + b4_ref[...]
    out_ref[...] = jax.nn.sigmoid(logits)                      # Sigmoid (f32 EUP)

    musig_ref[...] = mid                                       # [mu | sigma] fused


def prepare_params(params):
    """One-time parameter prep (call OUTSIDE the per-step forward):
    transpose PyTorch (out, in) weights to (in, out), cast weights to bf16,
    keep biases f32 and 2-D (1, out) for clean TPU broadcasting."""
    w1, b1, w2, b2, w3, b3, w4, b4 = params
    return (
        w1.T.astype(jnp.bfloat16), b1.reshape(1, -1).astype(jnp.float32),
        w2.T.astype(jnp.bfloat16), b2.reshape(1, -1).astype(jnp.float32),
        w3.T.astype(jnp.bfloat16), b3.reshape(1, -1).astype(jnp.float32),
        w4.T.astype(jnp.bfloat16), b4.reshape(1, -1).astype(jnp.float32),
    )


def vae_forward(x, prepped, noise):
    """x: (B, C, H, W) float32. prepped: output of prepare_params.
    Returns (result NCHW, mu, sigma)."""
    B, C, H, W = x.shape
    D = C * H * W
    x_flat = x.reshape(B, D)

    w1_t, b1_2d, w2_t, b2_2d, w3_t, b3_2d, w4_t, b4_2d = prepped
    F1 = w1_t.shape[1]
    two_l = w2_t.shape[1]
    L = two_l // 2

    vmem_spec = pl.BlockSpec(memory_space=pltpu.MemorySpace.VMEM)
    n_inputs = 10

    flops = 2 * B * (D * F1 + F1 * two_l + L * F1 + F1 * D)
    bytes_accessed = (
        sum(int(a.size) * a.dtype.itemsize
            for a in (w1_t, w2_t, w3_t, w4_t, b1_2d, b2_2d, b3_2d, b4_2d))
        + x_flat.size * 4 + noise.size * 4            # inputs
        + B * D * 4 + B * two_l * 4                   # outputs
    )

    out_flat, musig = pl.pallas_call(
        _vae_kernel,
        out_shape=(
            jax.ShapeDtypeStruct((B, D), jnp.float32),
            jax.ShapeDtypeStruct((B, two_l), jnp.float32),
        ),
        in_specs=[vmem_spec] * n_inputs,
        out_specs=(vmem_spec, vmem_spec),
        compiler_params=pltpu.CompilerParams(vmem_limit_bytes=8 << 20),
        cost_estimate=pl.CostEstimate(
            flops=flops,
            transcendentals=B * D,            # sigmoid on the decoder output
            bytes_accessed=bytes_accessed),
    )(x_flat, w1_t, b1_2d, w2_t, b2_2d, w3_t, b3_2d, w4_t, b4_2d, noise)

    result = out_flat.reshape(B, C, H, W)
    mu = musig[:, :L]
    sigma = musig[:, L:]
    return result, mu, sigma


def init_params(key, img_channel, img_size, encode_f1_size, latent_size):
    """Deterministic parameter init mimicking nn.Linear shapes: W=(out,in), b=(out,)."""
    D = img_channel * img_size ** 2
    shapes = [
        ((encode_f1_size, D), (encode_f1_size,)),                 # encode[0]
        ((latent_size * 2, encode_f1_size), (latent_size * 2,)),  # encode[2]
        ((encode_f1_size, latent_size), (encode_f1_size,)),       # decode[0]
        ((D, encode_f1_size), (D,)),                              # decode[2]
    ]
    params = []
    for (w_shape, b_shape) in shapes:
        key, kw, kb = jax.random.split(key, 3)
        fan_in = w_shape[1]
        bound = 1.0 / jnp.sqrt(fan_in)
        params.append(jax.random.uniform(kw, w_shape, jnp.float32, -bound, bound))
        params.append(jax.random.uniform(kb, b_shape, jnp.float32, -bound, bound))
    return tuple(params)


if __name__ == "__main__":
    # Small shapes consistent with the module.
    batch = 2
    img_channel = 4
    img_size = 16
    encode_f1_size = 128
    latent_size = 32

    root = jax.random.PRNGKey(0)
    k_params, k_x, k_noise = jax.random.split(root, 3)

    params = init_params(k_params, img_channel, img_size, encode_f1_size, latent_size)
    # One-time prep: transpose + bf16 cast, hoisted out of the forward path.
    prepped = jax.tree_util.tree_map(jax.device_put, prepare_params(params))

    x = jax.random.normal(k_x, (batch, img_channel, img_size, img_size), jnp.float32)
    # Noise for the reparameterization trick (torch.randn_like(sigma)).
    noise = jax.random.normal(k_noise, (batch, latent_size), jnp.float32)

    fwd = jax.jit(functools.partial(vae_forward))
    result, mu, sigma = fwd(x, prepped, noise)
    jax.block_until_ready((result, mu, sigma))

    assert result.shape == x.shape
    assert mu.shape == (batch, latent_size)
    assert sigma.shape == (batch, latent_size)

    # Cross-check against a pure-JAX f32 reference of the same math.
    # Tolerances loosened because the kernel uses bf16 weights/LHS on the MXU
    # (f32 accumulation); expect ~1e-2-level relative differences.
    def ref(x, params, noise):
        w1, b1, w2, b2, w3, b3, w4, b4 = params
        xf = x.reshape(x.shape[0], -1)
        h1 = jax.nn.relu(xf @ w1.T + b1)
        mid = jax.nn.relu(h1 @ w2.T + b2)
        mu_r, sg_r = jnp.split(mid, 2, axis=1)
        lat = mu_r + sg_r * noise
        h2 = jax.nn.relu(lat @ w3.T + b3)
        out = jax.nn.sigmoid(h2 @ w4.T + b4)
        return out.reshape(x.shape), mu_r, sg_r

    r_ref, mu_r, sg_r = ref(x, params, noise)
    assert jnp.allclose(result, r_ref, atol=5e-2, rtol=5e-2)
    assert jnp.allclose(mu, mu_r, atol=5e-2, rtol=5e-2)
    assert jnp.allclose(sigma, sg_r, atol=5e-2, rtol=5e-2)

    print("KERNEL_OK")
</pallas_src>

<mosaic_0001>
module attributes {stable_mosaic.version = 11 : i64} {
  func.func @_vae_kernel(%arg0: memref<2x1024xf32, #tpu.memory_space<vmem>>, %arg1: memref<1024x128xbf16, #tpu.memory_space<vmem>>, %arg2: memref<1x128xf32, #tpu.memory_space<vmem>>, %arg3: memref<128x64xbf16, #tpu.memory_space<vmem>>, %arg4: memref<1x64xf32, #tpu.memory_space<vmem>>, %arg5: memref<32x128xbf16, #tpu.memory_space<vmem>>, %arg6: memref<1x128xf32, #tpu.memory_space<vmem>>, %arg7: memref<128x1024xbf16, #tpu.memory_space<vmem>>, %arg8: memref<1x1024xf32, #tpu.memory_space<vmem>>, %arg9: memref<2x32xf32, #tpu.memory_space<vmem>>, %arg10: memref<2x1024xf32, #tpu.memory_space<vmem>>, %arg11: memref<2x64xf32, #tpu.memory_space<vmem>>) attributes {dimension_semantics = [], scalar_prefetch = 0 : i64, scratch_operands = 0 : i64, tpu.core_type = #tpu.core_type<tc>} {
    %c0 = arith.constant 0 : index
    %c0_0 = arith.constant 0 : index
    %0 = vector.load %arg0[%c0, %c0_0] : memref<2x1024xf32, #tpu.memory_space<vmem>>, vector<2x1024xf32>
    %1 = arith.truncf %0 : vector<2x1024xf32> to vector<2x1024xbf16>
    %c0_1 = arith.constant 0 : index
    %c0_2 = arith.constant 0 : index
    %2 = vector.load %arg1[%c0_1, %c0_2] : memref<1024x128xbf16, #tpu.memory_space<vmem>>, vector<1024x128xbf16>
    %cst = arith.constant dense<0.000000e+00> : vector<2x128xf32>
    %3 = tpu.matmul %1, %2, %cst {dimension_numbers = #tpu.dot_dimension_numbers<[1], [0], [0], [1], [0, 0, 1, 1], [], []>} : vector<2x1024xbf16>, vector<1024x128xbf16>, vector<2x128xf32> -> vector<2x128xf32>
    %c0_3 = arith.constant 0 : index
    %c0_4 = arith.constant 0 : index
    %4 = vector.load %arg2[%c0_3, %c0_4] : memref<1x128xf32, #tpu.memory_space<vmem>>, vector<1x128xf32>
    %5 = vector.broadcast %4 : vector<1x128xf32> to vector<2x128xf32>
    %6 = arith.addf %3, %5 : vector<2x128xf32>
    %cst_5 = arith.constant 0.000000e+00 : f32
    %7 = vector.broadcast %cst_5 : f32 to vector<2x128xf32>
    %8 = arith.maximumf %6, %7 : vector<2x128xf32>
    %9 = arith.truncf %8 : vector<2x128xf32> to vector<2x128xbf16>
    %c0_6 = arith.constant 0 : index
    %c0_7 = arith.constant 0 : index
    %10 = vector.load %arg3[%c0_6, %c0_7] : memref<128x64xbf16, #tpu.memory_space<vmem>>, vector<128x64xbf16>
    %cst_8 = arith.constant dense<0.000000e+00> : vector<2x64xf32>
    %11 = tpu.matmul %9, %10, %cst_8 {dimension_numbers = #tpu.dot_dimension_numbers<[1], [0], [0], [1], [0, 0, 1, 1], [], []>} : vector<2x128xbf16>, vector<128x64xbf16>, vector<2x64xf32> -> vector<2x64xf32>
    %c0_9 = arith.constant 0 : index
    %c0_10 = arith.constant 0 : index
    %12 = vector.load %arg4[%c0_9, %c0_10] : memref<1x64xf32, #tpu.memory_space<vmem>>, vector<1x64xf32>
    %13 = vector.broadcast %12 : vector<1x64xf32> to vector<2x64xf32>
    %14 = arith.addf %11, %13 : vector<2x64xf32>
    %cst_11 = arith.constant 0.000000e+00 : f32
    %15 = vector.broadcast %cst_11 : f32 to vector<2x64xf32>
    %16 = arith.maximumf %14, %15 : vector<2x64xf32>
    %17 = vector.extract_strided_slice %16 {offsets = [0, 0], sizes = [2, 32], strides = [1, 1]} : vector<2x64xf32> to vector<2x32xf32>
    %18 = vector.extract_strided_slice %16 {offsets = [0, 32], sizes = [2, 32], strides = [1, 1]} : vector<2x64xf32> to vector<2x32xf32>
    %c0_12 = arith.constant 0 : index
    %c0_13 = arith.constant 0 : index
    %19 = vector.load %arg9[%c0_12, %c0_13] : memref<2x32xf32, #tpu.memory_space<vmem>>, vector<2x32xf32>
    %20 = arith.mulf %18, %19 : vector<2x32xf32>
    %21 = arith.addf %17, %20 : vector<2x32xf32>
    %22 = arith.truncf %21 : vector<2x32xf32> to vector<2x32xbf16>
    %c0_14 = arith.constant 0 : index
    %c0_15 = arith.constant 0 : index
    %23 = vector.load %arg5[%c0_14, %c0_15] : memref<32x128xbf16, #tpu.memory_space<vmem>>, vector<32x128xbf16>
    %cst_16 = arith.constant dense<0.000000e+00> : vector<2x128xf32>
    %24 = tpu.matmul %22, %23, %cst_16 {dimension_numbers = #tpu.dot_dimension_numbers<[1], [0], [0], [1], [0, 0, 1, 1], [], []>} : vector<2x32xbf16>, vector<32x128xbf16>, vector<2x128xf32> -> vector<2x128xf32>
    %c0_17 = arith.constant 0 : index
    %c0_18 = arith.constant 0 : index
    %25 = vector.load %arg6[%c0_17, %c0_18] : memref<1x128xf32, #tpu.memory_space<vmem>>, vector<1x128xf32>
    %26 = vector.broadcast %25 : vector<1x128xf32> to vector<2x128xf32>
    %27 = arith.addf %24, %26 : vector<2x128xf32>
    %cst_19 = arith.constant 0.000000e+00 : f32
    %28 = vector.broadcast %cst_19 : f32 to vector<2x128xf32>
    %29 = arith.maximumf %27, %28 : vector<2x128xf32>
    %30 = arith.truncf %29 : vector<2x128xf32> to vector<2x128xbf16>
    %c0_20 = arith.constant 0 : index
    %c0_21 = arith.constant 0 : index
    %31 = vector.load %arg7[%c0_20, %c0_21] : memref<128x1024xbf16, #tpu.memory_space<vmem>>, vector<128x1024xbf16>
    %cst_22 = arith.constant dense<0.000000e+00> : vector<2x1024xf32>
    %32 = tpu.matmul %30, %31, %cst_22 {dimension_numbers = #tpu.dot_dimension_numbers<[1], [0], [0], [1], [0, 0, 1, 1], [], []>} : vector<2x128xbf16>, vector<128x1024xbf16>, vector<2x1024xf32> -> vector<2x1024xf32>
    %c0_23 = arith.constant 0 : index
    %c0_24 = arith.constant 0 : index
    %33 = vector.load %arg8[%c0_23, %c0_24] : memref<1x1024xf32, #tpu.memory_space<vmem>>, vector<1x1024xf32>
    %34 = vector.broadcast %33 : vector<1x1024xf32> to vector<2x1024xf32>
    %35 = arith.addf %32, %34 : vector<2x1024xf32>
    %36 = arith.negf %35 : vector<2x1024xf32>
    %37 = math.exp %36 : vector<2x1024xf32>
    %cst_25 = arith.constant 1.000000e+00 : f32
    %38 = vector.broadcast %cst_25 : f32 to vector<2x1024xf32>
    %39 = arith.addf %38, %37 : vector<2x1024xf32>
    %40 = arith.divf %38, %39 : vector<2x1024xf32>
    %c0_26 = arith.constant 0 : index
    %c0_27 = arith.constant 0 : index
    %41 = vector.load %arg10[%c0_26, %c0_27] : memref<2x1024xf32, #tpu.memory_space<vmem>>, vector<2x1024xf32>
    tpu.vector_store %arg10[%c0_26, %c0_27], %40 {strides = array<i32>} : memref<2x1024xf32, #tpu.memory_space<vmem>>, vector<2x1024xf32>,
    %c0_28 = arith.constant 0 : index
    %c0_29 = arith.constant 0 : index
    %42 = vector.load %arg11[%c0_28, %c0_29] : memref<2x64xf32, #tpu.memory_space<vmem>>, vector<2x64xf32>
    tpu.vector_store %arg11[%c0_28, %c0_29], %16 {strides = array<i32>} : memref<2x64xf32, #tpu.memory_space<vmem>>, vector<2x64xf32>,
    return
  }
}

</mosaic_0001>

<bundles_post_ra>
// kernel: vae_forward.1
= control target key start
LH: loop header
LB: loop body
LE: loop exit
PB: predicated region body
PF: predicated region fallthrough
CT: control target
= control target key end

     0   :  { %17 = vsyncpa [#allocation3], 0  ;;  %s2330_s0 = inlined_call_operand.vmem [shape: f32[2,1024], index: 0, kind: input, shape index: {}]   ;;  %s2331_s1 = inlined_call_operand.hbm [shape: bf16[1024,128], index: 1, kind: input, shape index: {}]   ;;  %s2332_s2 = inlined_call_operand.vmem [shape: f32[1,128], index: 2, kind: input, shape index: {}]   ;;  %s2333_s3 = inlined_call_operand.vmem [shape: bf16[128,64], index: 3, kind: input, shape index: {}]   ;;  %s2334_s4 = inlined_call_operand.vmem [shape: f32[1,64], index: 4, kind: input, shape index: {}]   ;;  %s2335_s5 = inlined_call_operand.vmem [shape: bf16[32,128], index: 5, kind: input, shape index: {}]   ;;  %s2336_s6 = inlined_call_operand.vmem [shape: f32[1,128], index: 6, kind: input, shape index: {}]   ;;  %s2337_s7 = inlined_call_operand.hbm [shape: bf16[128,1024], index: 7, kind: input, shape index: {}]   ;;  %s2338_s8 = inlined_call_operand.vmem [shape: f32[1,1024], index: 8, kind: input, shape index: {}]   ;;  %s2339_s9 = inlined_call_operand.vmem [shape: f32[2,32], index: 9, kind: input, shape index: {}]   ;;  %s2340_s10 = inlined_call_operand.vmem [shape: f32[2,1024], index: 10, kind: output, shape index: {0}]   ;;  %s2341_s11 = inlined_call_operand.vmem [shape: f32[2,64], index: 11, kind: output, shape index: {1}]  }
   0x1   :  { %18 = vsyncpa [#allocation5], 0  ;;  %s2135_s17 = smov [#allocation2]   ;;  %s2087_s21 = scalar_lea.hbm %s2331_s1, 8192 }
   0x2   :  { %s26_s18 = sshll.u32 %s2135_s17, 4  ;;  %p2088_p0 = scmp.ne.s32.totalorder %s2331_s1, %s2087_s21  ;;  %s27_s18 = int_to_ptr.vmem [resolvable:$true] %s26_s18 }
   0x3   :  { %p2091_p1 = scmp.lt.u32.totalorder %s2087_s21, %s2331_s1 }
   0x5   :  { %p2093_p2 = pnand %p2091_p1, %p2088_p0 }
   0x7   :  { %2096 = shalt.err (!%p2093_p2)
}
   0x8   :  { %s2097_s26 = scalar_lea.vmem %s27_s18, 8192  ;;  %p2102_p4 = scmp.lt.s32.totalorder %s27_s18, %s27_s18 }
   0x9   :  { %p2098_p3 = scmp.ne.s32.totalorder %s27_s18, %s2097_s26  ;;  %p2103_p5 = scmp.lt.s32.totalorder %s2097_s26, %s2097_s26 }
   0xb   :  { %p2104_p6 = por %p2103_p5, %p2102_p4 }
   0xd   :  { %p2105_p7 = pnand %p2104_p6, %p2098_p3 }
   0xf   :  { %2108 = shalt.err (!%p2105_p7)
}
  0x10   :  { %s2136_s27 = smov 64   ;;  %s2137_s28 = smov 4  }
  0x11   :  { %32 = dma.hbm_to_vmem [thread:$0]  %s2331_s1, 8192, %s27_s18, [#allocation3], %s2136_s27, %s2136_s27, %s2137_s28  }
  0x12   :  { %s2138_s12 = smov [#allocation4]   ;;  %s2109_s16 = scalar_lea.hbm %s2337_s7, 8192 }
  0x13   :  { %s48_s13 = sshll.u32 %s2138_s12, 4  ;;  %p2110_p8 = scmp.ne.s32.totalorder %s2337_s7, %s2109_s16  ;;  %s49_s13 = int_to_ptr.vmem [resolvable:$true] %s48_s13 }
  0x14   :  { %p2113_p9 = scmp.lt.u32.totalorder %s2109_s16, %s2337_s7 }
  0x16   :  { %p2115_p10 = pnand %p2113_p9, %p2110_p8 }
  0x18   :  { %2118 = shalt.err (!%p2115_p10)
}
  0x19   :  { %s2119_s22 = scalar_lea.vmem %s49_s13, 8192  ;;  %p2124_p12 = scmp.lt.s32.totalorder %s49_s13, %s49_s13 }
  0x1a   :  { %p2120_p11 = scmp.ne.s32.totalorder %s49_s13, %s2119_s22  ;;  %p2125_p13 = scmp.lt.s32.totalorder %s2119_s22, %s2119_s22 }
  0x1c   :  { %p2126_p0 = por %p2125_p13, %p2124_p12 }
  0x1e   :  { %p2127_p1 = pnand %p2126_p0, %p2120_p11 }
  0x20   :  { %2130 = shalt.err (!%p2127_p1)
}
  0x21   :  { %s2139_s1 = smov 512   ;;  %s2140_s18 = smov 32  }
  0x22   :  { %54 = dma.hbm_to_vmem [thread:$0]  %s2337_s7, 8192, %s49_s13, [#allocation5], %s2139_s1, %s2139_s1, %s2140_s18  }
  0x23   :  { %2131 = dma.done.wait [#allocation3], 8192  }
  0x24   :  { %2132 = vsyncadd [#allocation3], 4294959104 }
  0x25   :  { %2133 = dma.done.wait [#allocation5], 8192  }
  0x26   :  { %2134 = vsyncadd [#allocation5], 4294959104  ;;  %v1979_v0 = vld [vmem:[#allocation2 + $0x40] sm:$0xff]   ;;  %v1983_v4 = vld [vmem:[#allocation2 + $0x48] sm:$0xff]   ;;  %v2141_v22 = vmov 1983009808   ;;  %v74_v24 = vlaneseq }
  0x27   :  { %v1980_v1 = vld [vmem:[#allocation2 + $0xc0] sm:$0xff]   ;;  %1840 = vmatprep.subr.bf16.mxu0 %v1979_v0  ;;  %v1984_v5 = vld [vmem:[#allocation2 + $0xc8] sm:$0xff]   ;;  %v1987_v8 = vld [vmem:[#allocation2 + $0x50] sm:$0xff]   ;;  %v72_v23 = vunpack.c.l.s4 %v2141_v22  ;;  %vm2143_vm0 = vmmov 0   ;;  %vm1678_vm1 = vcmask 517120   ;;  %s2144_s28 = smov 96  }
  0x28   :  { %v1981_v2 = vld [vmem:[#allocation2] sm:$0xff]   ;;  %1862 = vmatprep.subr.bf16.mxu1 %v1980_v1  ;;  %v1985_v6 = vld [vmem:[#allocation2 + $0x8] sm:$0xff]   ;;  %v1988_v9 = vld [vmem:[#allocation2 + $0xd0] sm:$0xff]   ;;  %v2231_v30 = vshrl.u32 %v74_v24, 7  ;;  %vm948_vm2 = vcmask 261120  }
  0x29   :  { %v1982_v3 = vld [vmem:[#allocation2 + $0x80] sm:$0xff]   ;;  %1841 = vmatpush3.bf16.msra.mxu0 %v1981_v2  ;;  %v1986_v7 = vld [vmem:[#allocation2 + $0x88] sm:$0xff]   ;;  %v1989_v10 = vld [vmem:[#allocation2 + $0x10] sm:$0xff]   ;;  %v73_v29 = vunpack.c.0.s8 %v72_v23 }
  0x2a   :  { %1863 = vmatpush3.bf16.msra.mxu1 %v1982_v3  ;;  %1842 = vmatprep.subr.bf16.mxu0 %v1983_v4  ;;  %v1990_v11 = vld [vmem:[#allocation2 + $0x90] sm:$0xff]   ;;  %v1991_v12 = vld [vmem:[#allocation2 + $0x58] sm:$0xff]   ;;  %v1995_v16 = vld [vmem:[#allocation2 + $0x60] sm:$0xff]  }
  0x2b   :  { %1864 = vmatprep.subr.bf16.mxu1 %v1984_v5  ;;  %v1992_v13 = vld [vmem:[#allocation2 + $0xd8] sm:$0xff]   ;;  %v1996_v17 = vld [vmem:[#allocation2 + $0xe0] sm:$0xff]   ;;  %v1999_v20 = vld [vmem:[#allocation2 + $0x68] sm:$0xff]   ;;  %v2234_v35 = vsub.s32 %v73_v29, %v2231_v30 }
  0x2c   :  { %v1993_v14 = vld [vmem:[#allocation2 + $0x18] sm:$0xff]   ;;  %v1997_v18 = vld [vmem:[#allocation2 + $0x20] sm:$0xff]   ;;  %v2000_v21 = vld [vmem:[#allocation2 + $0xe8] sm:$0xff]  }
  0x2d   :  { %1843 = vmatpush3.bf16.msra.mxu0 %v1985_v6  ;;  %v1994_v15 = vld [vmem:[#allocation2 + $0x98] sm:$0xff]   ;;  %v1998_v19 = vld [vmem:[#allocation2 + $0xa0] sm:$0xff]   ;;  %v2001_v25 = vld [vmem:[#allocation2 + $0x28] sm:$0xff]  }
  0x2e   :  { %1865 = vmatpush3.bf16.msra.mxu1 %v1986_v7  ;;  %1844 = vmatprep.subr.bf16.mxu0 %v1987_v8  ;;  %v2002_v26 = vld [vmem:[#allocation2 + $0xa8] sm:$0xff]   ;;  %v2003_v27 = vld [vmem:[#allocation2 + $0x70] sm:$0xff]   ;;  %v2007_v33 = vld [vmem:[#allocation2 + $0x78] sm:$0xff]  }
  0x2f   :  { %1866 = vmatprep.subr.bf16.mxu1 %v1988_v9  ;;  %v2004_v28 = vld [vmem:[#allocation2 + $0xf0] sm:$0xff]   ;;  %v2008_v34 = vld [vmem:[#allocation2 + $0xf8] sm:$0xff]   ;;  %v66_v38 = vld [vmem:[%s2330_s0] sm:$0xff] }
  0x30   :  { %v2005_v31 = vld [vmem:[#allocation2 + $0x30] sm:$0xff]   ;;  %v2009_v36 = vld [vmem:[#allocation2 + $0x38] sm:$0xff]   ;;  %v77_v39 = vrot.slane %v66_v38, %v2234_v35  ;;  %v70_v40 = vcombine.high %v66_v38, %v66_v38  ;;  %v2012_v41 = vld [vmem:[#allocation2 + $0x140] sm:$0xff]  }
  0x31   :  { %1845 = vmatpush3.bf16.msra.mxu0 %v1989_v10  ;;  %v2006_v32 = vld [vmem:[#allocation2 + $0xb0] sm:$0xff]   ;;  %v2010_v37 = vld [vmem:[#allocation2 + $0xb8] sm:$0xff]   ;;  %v2013_v42 = vld [vmem:[#allocation2 + $0x1c0] sm:$0xff]  }
  0x32   :  { %1867 = vmatpush3.bf16.msra.mxu1 %v1990_v11  ;;  %1846 = vmatprep.subr.bf16.mxu0 %v1991_v12  ;;  %v85_v43 = vcombine.high %v77_v39, %v77_v39  ;;  %v84_v44 = vrot.slane %v70_v40, %v2234_v35  ;;  %v112_v45 = vpack.c.bf16 %v77_v39, %v77_v39  ;;  %v2014_v46 = vld [vmem:[#allocation2 + $0x100] sm:$0xff]   ;;  %v2016_v51 = vld [vmem:[#allocation2 + $0x148] sm:$0xff]   ;;  %v2020_v56 = vld [vmem:[#allocation2 + $0x150] sm:$0xff]  }
  0x33   :  { %1868 = vmatprep.subr.bf16.mxu1 %v1992_v13  ;;  %v2015_v49 = vld [vmem:[#allocation2 + $0x180] sm:$0xff]   ;;  %v2017_v53 = vld [vmem:[#allocation2 + $0x1c8] sm:$0xff]   ;;  %v2021_v57 = vld [vmem:[#allocation2 + $0x1d0] sm:$0xff]  }
  0x34   :  { %v113_v47 = vpack.c.bf16 %v85_v43, %v85_v43  ;;  %v86_v48 = vcombine.high %v84_v44, %v84_v44  ;;  %v114_v50 = vpack.c.bf16 %v84_v44, %v84_v44  ;;  %v2018_v54 = vld [vmem:[#allocation2 + $0x108] sm:$0xff]   ;;  %v2022_v58 = vld [vmem:[#allocation2 + $0x110] sm:$0xff]   ;;  %v2024_v60 = vld [vmem:[#allocation2 + $0x158] sm:$0xff]  }
  0x35   :  { %1847 = vmatpush3.bf16.msra.mxu0 %v1993_v14  ;;  %v2019_v55 = vld [vmem:[#allocation2 + $0x188] sm:$0xff]   ;;  %v2023_v59 = vld [vmem:[#allocation2 + $0x190] sm:$0xff]   ;;  %v2025_v61 = vld [vmem:[#allocation2 + $0x1d8] sm:$0xff]  }
  0x36   :  { %1869 = vmatpush3.bf16.msra.mxu1 %v1994_v15  ;;  %1848 = vmatprep.subr.bf16.mxu0 %v1995_v16  ;;  %v115_v52 = vpack.c.bf16 %v86_v48, %v86_v48  ;;  %v2026_v62 = vld [vmem:[#allocation2 + $0x118] sm:$0xff]   ;;  %v2028_v0 = vld [vmem:[#allocation2 + $0x160] sm:$0xff]   ;;  %v2032_v4 = vld [vmem:[#allocation2 + $0x168] sm:$0xff]  }
  0x37   :  { %1870 = vmatprep.subr.bf16.mxu1 %v1996_v17  ;;  %671 = vmatprep.mubr.bf16.mxu0 %v113_v47  ;;  %v2027_v63 = vld [vmem:[#allocation2 + $0x198] sm:$0xff]   ;;  %v2029_v1 = vld [vmem:[#allocation2 + $0x1e0] sm:$0xff]   ;;  %v2033_v5 = vld [vmem:[#allocation2 + $0x1e8] sm:$0xff]  }
  0x38   :  { %711 = vmatprep.mubr.bf16.mxu1 %v115_v52  ;;  %v2030_v2 = vld [vmem:[#allocation2 + $0x120] sm:$0xff]   ;;  %v2034_v6 = vld [vmem:[#allocation2 + $0x128] sm:$0xff]   ;;  %v2036_v8 = vld [vmem:[#allocation2 + $0x170] sm:$0xff]  }
  0x39   :  { %1849 = vmatpush3.bf16.msra.mxu0 %v1997_v18  ;;  %v2031_v3 = vld [vmem:[#allocation2 + $0x1a0] sm:$0xff]   ;;  %v2035_v7 = vld [vmem:[#allocation2 + $0x1a8] sm:$0xff]   ;;  %v2037_v9 = vld [vmem:[#allocation2 + $0x1f0] sm:$0xff]  }
  0x3a   :  { %1871 = vmatpush3.bf16.msra.mxu1 %v1998_v19  ;;  %1850 = vmatprep.subr.bf16.mxu0 %v1999_v20  ;;  %v2038_v10 = vld [vmem:[#allocation2 + $0x130] sm:$0xff]   ;;  %v2040_v12 = vld [vmem:[#allocation2 + $0x178] sm:$0xff]   ;;  %v67_v15 = vld [vmem:[%s2330_s0 + $0x8] sm:$0xff] }
  0x3b   :  { %1872 = vmatprep.subr.bf16.mxu1 %v2000_v21  ;;  %v2039_v11 = vld [vmem:[#allocation2 + $0x1b0] sm:$0xff]   ;;  %v2041_v13 = vld [vmem:[#allocation2 + $0x1f8] sm:$0xff]   ;;  %v94_v17 = vrot.slane %v67_v15, %v2234_v35  ;;  %v87_v18 = vcombine.high %v67_v15, %v67_v15  ;;  %v1690_v39 = vld [vmem:[%s2332_s2] ss:$0 sm:$0xff] }
  0x3c   :  { %v2042_v14 = vld [vmem:[#allocation2 + $0x138] sm:$0xff]   ;;  %v2047_v29 = vld [vmem:[%s2333_s3 + $0x10] sm:$0xff]  }
  0x3d   :  { %1851 = vmatpush3.bf16.msra.mxu0 %v2001_v25  ;;  %v2043_v16 = vld [vmem:[#allocation2 + $0x1b8] sm:$0xff]   ;;  %v102_v19 = vcombine.high %v94_v17, %v94_v17  ;;  %v101_v20 = vrot.slane %v87_v18, %v2234_v35  ;;  %v116_v21 = vpack.c.bf16 %v94_v17, %v94_v17 }
  0x3e   :  { %1873 = vmatpush3.bf16.msra.mxu1 %v2002_v26  ;;  %1852 = vmatprep.subr.bf16.mxu0 %v2003_v27  ;;  %v2045_v26 = vld [vmem:[%s2333_s3] sm:$0xff]   ;;  %v2142_v27 = vmov 0.0  }
  0x3f   :  { %1874 = vmatprep.subr.bf16.mxu1 %v2004_v28  ;;  %v117_v22 = vpack.c.bf16 %v102_v19, %v102_v19  ;;  %v103_v23 = vcombine.high %v101_v20, %v101_v20  ;;  %v118_v24 = vpack.c.bf16 %v101_v20, %v101_v20  ;;  %v2046_v28 = vld [vmem:[%s2333_s3 + $0x8] sm:$0xff]  }
  0x41   :  { %1853 = vmatpush3.bf16.msra.mxu0 %v2005_v31  ;;  %v119_v25 = vpack.c.bf16 %v103_v23, %v103_v23  ;;  %v2048_v31 = vld [vmem:[%s2333_s3 + $0x18] sm:$0xff]   ;;  %v1011_v23 = vld [vmem:[#allocation4 + $0x88] sm:$0xff] }
  0x42   :  { %1875 = vmatpush3.bf16.msra.mxu1 %v2006_v32  ;;  %1854 = vmatprep.subr.bf16.mxu0 %v2007_v33  ;;  %v2049_v32 = vld [vmem:[%s2333_s3 + $0x20] sm:$0xff]   ;;  %v2050_v33 = vld [vmem:[%s2333_s3 + $0x28] sm:$0xff]  }
  0x43   :  { %1876 = vmatprep.subr.bf16.mxu1 %v2008_v34  ;;  %v2051_v34 = vld [vmem:[%s2333_s3 + $0x30] sm:$0xff]  }
  0x45   :  { %1855 = vmatpush3.bf16.msra.mxu0 %v2009_v36  ;;  %v2052_v36 = vld [vmem:[%s2333_s3 + $0x38] sm:$0xff]  }
  0x46   :  { %1877 = vmatpush3.bf16.msra.mxu1 %v2010_v37  ;;  %1884 = vmatprep.subr.bf16.mxu0 %v2012_v41  ;;  %v913_v37 = vld [vmem:[%s2339_s9] sm:$0x3] }
  0x47   :  { %1906 = vmatprep.subr.bf16.mxu1 %v2013_v42  ;;  %915 = vrot.lane.b32.xlu0 %v913_v37, %s2140_s18 }
  0x48   :  { %672 = vmatmul.mubr.bf16.vlgmr.msra.gmra.mrb[0].mxu0 %v112_v45 }
  0x49   :  { %1885 = vmatpush3.bf16.msra.mxu0 %v2014_v46  ;;  %712 = vmatmul.mubr.bf16.vlgmr.msra.gmra.mrb[0].mxu1 %v114_v50 }
  0x4a   :  { %1886 = vmatprep.subr.bf16.mxu0 %v2016_v51  ;;  %1907 = vmatpush3.bf16.msra.mxu1 %v2015_v49 }
  0x4b   :  { %1908 = vmatprep.subr.bf16.mxu1 %v2017_v53  ;;  %751 = vmatprep.mubr.bf16.mxu0 %v117_v22 }
  0x4c   :  { %791 = vmatprep.mubr.bf16.mxu1 %v119_v25 }
  0x4d   :  { %1887 = vmatpush3.bf16.msra.mxu0 %v2018_v54 }
  0x4e   :  { %1888 = vmatprep.subr.bf16.mxu0 %v2020_v56  ;;  %1909 = vmatpush3.bf16.msra.mxu1 %v2019_v55 }
  0x4f   :  { %1910 = vmatprep.subr.bf16.mxu1 %v2021_v57 }
  0x51   :  { %1889 = vmatpush3.bf16.msra.mxu0 %v2022_v58 }
  0x52   :  { %1890 = vmatprep.subr.bf16.mxu0 %v2024_v60  ;;  %1911 = vmatpush3.bf16.msra.mxu1 %v2023_v59 }
  0x53   :  { %1912 = vmatprep.subr.bf16.mxu1 %v2025_v61 }
  0x55   :  { %1891 = vmatpush3.bf16.msra.mxu0 %v2026_v62 }
  0x56   :  { %1892 = vmatprep.subr.bf16.mxu0 %v2028_v0  ;;  %1913 = vmatpush3.bf16.msra.mxu1 %v2027_v63 }
  0x57   :  { %1914 = vmatprep.subr.bf16.mxu1 %v2029_v1  ;;  %v2053_v1 = vld [vmem:[%s2335_s5] sm:$0xff]  }
  0x59   :  { %1893 = vmatpush3.bf16.msra.mxu0 %v2030_v2  ;;  %v2054_v2 = vld [vmem:[%s2335_s5 + $0x8] sm:$0xff]  }
  0x5a   :  { %1894 = vmatprep.subr.bf16.mxu0 %v2032_v4  ;;  %1915 = vmatpush3.bf16.msra.mxu1 %v2031_v3  ;;  %v1755_v3 = vld [vmem:[%s2334_s4] ss:$0 sm:$0xff] }
  0x5b   :  { %1916 = vmatprep.subr.bf16.mxu1 %v2033_v5  ;;  %v2286_v4 = vld [vmem:[#allocation4] sm:$0xff] }
  0x5c   :  { %v2288_v5 = vld [vmem:[#allocation4 + $0x20] sm:$0xff] }
  0x5d   :  { %1895 = vmatpush3.bf16.msra.mxu0 %v2034_v6  ;;  %v995_v6 = vld [vmem:[#allocation4 + $0x8] sm:$0xff] }
  0x5e   :  { %1896 = vmatprep.subr.bf16.mxu0 %v2036_v8  ;;  %1917 = vmatpush3.bf16.msra.mxu1 %v2035_v7  ;;  %v1768_v7 = vcombine.low %v2286_v4, %v2288_v5  ;;  %v1769_v8 = vcombine.high %v2286_v4, %v2288_v5  ;;  %v1042_v4 = vld [vmem:[#allocation4 + $0x180] sm:$0xff] }
  0x5f   :  { %1918 = vmatprep.subr.bf16.mxu1 %v2037_v9  ;;  %v999_v9 = vld [vmem:[#allocation4 + $0x28] sm:$0xff]  ;;  %v1046_v5 = vld [vmem:[#allocation4 + $0x1a0] sm:$0xff] }
  0x61   :  { %1897 = vmatpush3.bf16.msra.mxu0 %v2038_v10 }
  0x62   :  { %1898 = vmatprep.subr.bf16.mxu0 %v2040_v12  ;;  %1919 = vmatpush3.bf16.msra.mxu1 %v2039_v11  ;;  %v1770_v11 = vcombine.low %v995_v6, %v999_v9  ;;  %v1771_v12 = vcombine.high %v995_v6, %v999_v9  ;;  %v1050_v9 = vld [vmem:[#allocation4 + $0x1c0] sm:$0xff] }
  0x63   :  { %1920 = vmatprep.subr.bf16.mxu1 %v2041_v13  ;;  %v1003_v13 = vld [vmem:[#allocation4 + $0x48] sm:$0xff] }
  0x65   :  { %1899 = vmatpush3.bf16.msra.mxu0 %v2042_v14  ;;  %v1007_v14 = vld [vmem:[#allocation4 + $0x68] sm:$0xff] }
  0x66   :  { %1921 = vmatpush3.bf16.msra.mxu1 %v2043_v16  ;;  %1940 = vmatprep.subr.bf16.mxu0 %v2142_v27  ;;  %v1779_v17 = vcombine.high %v1003_v13, %v1007_v14  ;;  %v1778_v22 = vcombine.low %v1003_v13, %v1007_v14  ;;  %v1055_v13 = vld [vmem:[#allocation4 + $0x1e8] sm:$0xff] }
  0x67   :  { %1960 = vmatprep.subr.bf16.mxu1 %v2142_v27 }
  0x68   :  { %752 = vmatmul.mubr.bf16.vlgmr.msra.gmra.mrb[4].mxu0 %v116_v21 }
  0x69   :  { %792 = vmatmul.mubr.bf16.vlgmr.msra.gmra.mrb[4].mxu1 %v118_v24  ;;  %1941 = vmatpush3.bf16.msra.mxu0 %v2045_v26  ;;  %v1015_v24 = vld [vmem:[#allocation4 + $0xa8] sm:$0xff] }
  0x6a   :  { %1942 = vmatprep.subr.bf16.mxu0 %v2142_v27  ;;  %1956 = vmatprep.mubr.msk.bf16.mxu0 %vm2143_vm0, %v2142_v27  ;;  %v1787_v26 = vcombine.high %v1011_v23, %v1015_v24 }
  0x6b   :  { %1964 = vmatprep.mubr.msk.bf16.mxu1 %vm2143_vm0, %v2142_v27  ;;  %1961 = vmatpush3.bf16.msra.mxu1 %v2053_v1  ;;  %v1038_v1 = vld [vmem:[#allocation4 + $0x160] sm:$0xff] }
  0x6c   :  { %1962 = vmatprep.subr.bf16.mxu1 %v2142_v27 }
  0x6d   :  { %1943 = vmatpush3.bf16.msra.mxu0 %v2046_v28  ;;  %v1019_v28 = vld [vmem:[#allocation4 + $0xc8] sm:$0xff] }
  0x6e   :  { %1944 = vmatprep.subr.bf16.mxu0 %v2142_v27 }
  0x6f   :  { %1963 = vmatpush3.bf16.msra.mxu1 %v2054_v2 }
  0x70   :  { %1420 = vmatprep.subr.bf16.mxu1 %v1769_v8  ;;  %v1816_v8 = vcombine.low %v1042_v4, %v1046_v5 }
  0x71   :  { %1945 = vmatpush3.bf16.msra.mxu0 %v2047_v29  ;;  %v1023_v29 = vld [vmem:[#allocation4 + $0xe8] sm:$0xff] }
  0x72   :  { %1946 = vmatprep.subr.bf16.mxu0 %v2142_v27 }
  0x75   :  { %1947 = vmatpush3.bf16.msra.mxu0 %v2048_v31  ;;  %v1795_v31 = vcombine.high %v1019_v28, %v1023_v29 }
  0x76   :  { %1948 = vmatprep.subr.bf16.mxu0 %v2142_v27 }
  0x79   :  { %1949 = vmatpush3.bf16.msra.mxu0 %v2049_v32  ;;  %v1794_v32 = vcombine.low %v1019_v28, %v1023_v29 }
  0x7a   :  { %1950 = vmatprep.subr.bf16.mxu0 %v2142_v27 }
  0x7d   :  { %1951 = vmatpush3.bf16.msra.mxu0 %v2050_v33  ;;  %v1027_v33 = vld [vmem:[#allocation4 + $0x108] sm:$0xff] }
  0x7e   :  { %1952 = vmatprep.subr.bf16.mxu0 %v2142_v27 }
  0x81   :  { %1953 = vmatpush3.bf16.msra.mxu0 %v2051_v34  ;;  %v1031_v34 = vld [vmem:[#allocation4 + $0x128] sm:$0xff] }
  0x82   :  { %1954 = vmatprep.subr.bf16.mxu0 %v2142_v27  ;;  %v1786_v27 = vcombine.low %v1011_v23, %v1015_v24  ;;  %v1802_v37 = vcombine.low %v1027_v33, %v1031_v34  ;;  %v1001_v23 = vld [vmem:[#allocation4 + $0x38] sm:$0xff] }
  0x85   :  { %1955 = vmatpush3.bf16.msra.mxu0 %v2052_v36  ;;  %v1803_v36 = vcombine.high %v1027_v33, %v1031_v34  ;;  %v1008_v33 = vld [vmem:[#allocation4 + $0x70] sm:$0xff]  ;;  %v1005_v34 = vld [vmem:[#allocation4 + $0x58] sm:$0xff] }
  0x86   :  { %1461 = vmatprep.subr.bf16.mxu0 %v1771_v12 }
  0xb9   :  { %v916_v19 = vpop.permute.xlu0 %915 }
 0x11b   :  { %v1856_v38 = vpop.f32.mrb[0].mxu0 }
 0x11c   :  { %v1857_v40 = vpop.f32.mrb[1].mxu0  ;;  %v1878_v41 = vpop.f32.mrb[0].mxu1 }
 0x11d   :  { %v1858_v42 = vadd.f32 %v1857_v40, %v1856_v38  ;;  %v1859_v43 = vpop.f32.mrb[2].mxu0  ;;  %v1879_v44 = vpop.f32.mrb[1].mxu1  ;;  %v1035_v38 = vld [vmem:[#allocation4 + $0x148] sm:$0xff] }
 0x11e   :  { %v1860_v45 = vpop.f32.mrb[3].mxu0  ;;  %v1880_v47 = vadd.f32 %v1879_v44, %v1878_v41  ;;  %v1881_v48 = vpop.f32.mrb[2].mxu1  ;;  %v1047_v43 = vld [vmem:[#allocation4 + $0x1a8] sm:$0xff] }
 0x11f   :  { %v674_v46 = vadd.f32 %v1858_v42, %v1690_v39  ;;  %v1882_v49 = vpop.f32.mrb[3].mxu1  ;;  %v1039_v39 = vld [vmem:[#allocation4 + $0x168] sm:$0xff]  ;;  %v1006_v48 = vld [vmem:[#allocation4 + $0x60] sm:$0xff] }
 0x120   :  { %v1811_v40 = vcombine.high %v1035_v38, %v1039_v39  ;;  %v1810_v41 = vcombine.low %v1035_v38, %v1039_v39  ;;  %v1043_v42 = vld [vmem:[#allocation4 + $0x188] sm:$0xff] }
 0x121   :  { %v714_v50 = vadd.f32 %v1880_v47, %v674_v46  ;;  %v1819_v44 = vcombine.high %v1043_v42, %v1047_v43  ;;  %v1818_v45 = vcombine.low %v1043_v42, %v1047_v43  ;;  %v1002_v47 = vld [vmem:[#allocation4 + $0x40] sm:$0xff]  ;;  %v1012_v42 = vld [vmem:[#allocation4 + $0x90] sm:$0xff] }
 0x122   :  { %v1016_v43 = vld [vmem:[#allocation4 + $0xb0] sm:$0xff] }
 0x13b   :  { %v1900_v51 = vpop.f32.mrb[4].mxu0 }
 0x13c   :  { %v1901_v52 = vpop.f32.mrb[5].mxu0  ;;  %v1922_v53 = vpop.f32.mrb[4].mxu1 }
 0x13d   :  { %v1902_v54 = vadd.f32 %v1901_v52, %v1900_v51  ;;  %v1903_v55 = vpop.f32.mrb[6].mxu0  ;;  %v1923_v56 = vpop.f32.mrb[5].mxu1  ;;  %v1777_v51 = vcombine.high %v1002_v47, %v1006_v48  ;;  %v1010_v52 = vld [vmem:[#allocation4 + $0x80] sm:$0xff] }
 0x13e   :  { %v1904_v57 = vpop.f32.mrb[7].mxu0  ;;  %v1924_v59 = vadd.f32 %v1923_v56, %v1922_v53  ;;  %v1925_v60 = vpop.f32.mrb[6].mxu1  ;;  %v1014_v53 = vld [vmem:[#allocation4 + $0xa0] sm:$0xff] }
 0x13f   :  { %v754_v58 = vadd.f32 %v1902_v54, %v714_v50  ;;  %v1926_v61 = vpop.f32.mrb[7].mxu1  ;;  %v1776_v54 = vcombine.low %v1002_v47, %v1006_v48  ;;  %v1785_v55 = vcombine.high %v1010_v52, %v1014_v53  ;;  %v1018_v56 = vld [vmem:[#allocation4 + $0xc0] sm:$0xff]  ;;  %v1789_v48 = vcombine.high %v1012_v42, %v1016_v43 }
 0x140   :  { %v1022_v57 = vld [vmem:[#allocation4 + $0xe0] sm:$0xff] }
 0x141   :  { %v794_v62 = vadd.f32 %v1924_v59, %v754_v58  ;;  %v1784_v58 = vcombine.low %v1010_v52, %v1014_v53  ;;  %v1793_v59 = vcombine.high %v1018_v56, %v1022_v57  ;;  %v1026_v60 = vld [vmem:[#allocation4 + $0x100] sm:$0xff]  ;;  %v1021_v52 = vld [vmem:[#allocation4 + $0xd8] sm:$0xff] }
 0x142   :  { %v1030_v61 = vld [vmem:[#allocation4 + $0x120] sm:$0xff]  ;;  %v1025_v53 = vld [vmem:[#allocation4 + $0xf8] sm:$0xff] }
 0x143   :  { %v799_v63 = vmax.f32 %v794_v62, 0.0  ;;  %v1792_v62 = vcombine.low %v1018_v56, %v1022_v57  ;;  %v1800_v2 = vcombine.low %v1026_v60, %v1030_v61  ;;  %v1799_v57 = vcombine.high %v1021_v52, %v1025_v53 }
 0x145   :  { %v800_v0 = vpack.c.bf16 %v799_v63, %v799_v63  ;;  %v1801_v63 = vcombine.high %v1026_v60, %v1030_v61  ;;  %v1029_v60 = vld [vmem:[#allocation4 + $0x118] sm:$0xff] }
 0x146   :  { %v1033_v61 = vld [vmem:[#allocation4 + $0x138] sm:$0xff] }
 0x147   :  { %1957 = vmatmul.mubr.bf16.vlgmr.msra.gmra.mrb[8].mxu0 %v800_v0  ;;  %v1034_v0 = vld [vmem:[#allocation4 + $0x140] sm:$0xff] }
 0x148   :  { %1462 = vmatpush1.bf16.msra.mxu0 %v1770_v11  ;;  %v1808_v6 = vcombine.low %v1034_v0, %v1038_v1  ;;  %v1051_v11 = vld [vmem:[#allocation4 + $0x1c8] sm:$0xff] }
 0x149   :  { %1463 = vmatprep.subr.bf16.mxu0 %v1779_v17  ;;  %v996_v17 = vld [vmem:[#allocation4 + $0x10] sm:$0xff] }
 0x14c   :  { %1464 = vmatpush1.bf16.msra.mxu0 %v1778_v22 }
 0x14d   :  { %1465 = vmatprep.subr.bf16.mxu0 %v1787_v26  ;;  %v1764_v26 = vld [vmem:[%s2336_s6] ss:$0 sm:$0xff] }
 0x150   :  { %1466 = vmatpush1.bf16.msra.mxu0 %v1786_v27 }
 0x151   :  { %1467 = vmatprep.subr.bf16.mxu0 %v1795_v31  ;;  %v1004_v31 = vld [vmem:[#allocation4 + $0x50] sm:$0xff] }
 0x154   :  { %1468 = vmatpush1.bf16.msra.mxu0 %v1794_v32 }
 0x155   :  { %1469 = vmatprep.subr.bf16.mxu0 %v1803_v36  ;;  %v1009_v36 = vld [vmem:[#allocation4 + $0x78] sm:$0xff] }
 0x156   :  { %v1782_v47 = vcombine.low %v1005_v34, %v1009_v36 }
 0x158   :  { %1470 = vmatpush1.bf16.msra.mxu0 %v1802_v37 }
 0x159   :  { %1471 = vmatprep.subr.bf16.mxu0 %v1811_v40  ;;  %v1781_v40 = vcombine.high %v1004_v31, %v1008_v33 }
 0x15c   :  { %1472 = vmatpush1.bf16.msra.mxu0 %v1810_v41  ;;  %v1783_v41 = vcombine.high %v1005_v34, %v1009_v36 }
 0x15d   :  { %1473 = vmatprep.subr.bf16.mxu0 %v1819_v44  ;;  %v1013_v44 = vld [vmem:[#allocation4 + $0x98] sm:$0xff] }
 0x160   :  { %1474 = vmatpush1.bf16.msra.mxu0 %v1818_v45  ;;  %v1017_v45 = vld [vmem:[#allocation4 + $0xb8] sm:$0xff] }
 0x21a   :  { %v906_v10 = vpop.f32.mrb[8].mxu0 }
 0x21b   :  { %v907_v15 = vadd.f32 %v1755_v3, %v906_v10  ;;  %v1958_v16 = vpop.f32.mrb[9].mxu0  ;;  %v1809_v3 = vcombine.high %v1034_v0, %v1038_v1  ;;  %v1054_v10 = vld [vmem:[#allocation4 + $0x1e0] sm:$0xff]  ;;  %v1807_v1 = vcombine.high %v1029_v60, %v1033_v61 }
 0x21c   :  { %v909_v18 = vpop.f32.mrb[10].mxu0  ;;  %v1825_v12 = vcombine.high %v1050_v9, %v1054_v10  ;;  %v1824_v14 = vcombine.low %v1050_v9, %v1054_v10  ;;  %v1827_v16 = vcombine.high %v1051_v11, %v1055_v13  ;;  %v1044_v10 = vld [vmem:[#allocation4 + $0x190] sm:$0xff] }
 0x21d   :  { %v912_v20 = vmax.f32 %v907_v15, 0.0  ;;  %v1959_v21 = vpop.f32.mrb[11].mxu0  ;;  %v1826_v15 = vcombine.low %v1051_v11, %v1055_v13  ;;  %v1000_v18 = vld [vmem:[#allocation4 + $0x30] sm:$0xff]  ;;  %v1049_v13 = vld [vmem:[#allocation4 + $0x1b8] sm:$0xff] }
 0x21e   :  { %1475 = vmatprep.subr.bf16.mxu0 %v1827_v16  ;;  %v1772_v21 = vcombine.low %v996_v17, %v1000_v18  ;;  %v1773_v22 = vcombine.high %v996_v17, %v1000_v18  ;;  %v1048_v11 = vld [vmem:[#allocation4 + $0x1b0] sm:$0xff] }
 0x21f   :  { %1679 = vst.msk [vmem:[%s2341_s11] sm:$0x3] %vm1678_vm1, %v912_v20  ;;  %v918_v25 = vmul.f32 %v916_v19, %v912_v20  ;;  %v997_v19 = vld [vmem:[#allocation4 + $0x18] sm:$0xff]  ;;  %1476 = vmatpush1.bf16.msra.mxu0 %v1826_v15  ;;  %v1821_v16 = vcombine.high %v1044_v10, %v1048_v11  ;;  %v1052_v18 = vld [vmem:[#allocation4 + $0x1d0] sm:$0xff] }
 0x220   :  { %v1774_v24 = vcombine.low %v997_v19, %v1001_v23 }
 0x221   :  { %920 = vrot.lane.b32.xlu0 %v918_v25, %s2144_s28  ;;  %v1775_v25 = vcombine.high %v997_v19, %v1001_v23  ;;  %v1056_v19 = vld [vmem:[#allocation4 + $0x1f0] sm:$0xff] }
 0x223   :  { %1543 = vmatprep.subr.bf16.mxu0 %v1775_v25 }
 0x293   :  { %v921_v46 = vpop.permute.xlu0 %920 }
 0x294   :  { %v923_v49 = vadd.f32 %v921_v46, %v912_v20  ;;  %v2145_v20 = vmov 0   ;;  %v1780_v46 = vcombine.low %v1004_v31, %v1008_v33  ;;  %v1058_v31 = vld [vmem:[%s2338_s8] sm:$0xff]  ;;  %v1074_v33 = vsub.s32 3, %v2231_v30 }
 0x295   :  { %1493 = vmatprep.mubr.bf16.mxu0 %v2145_v20 }
 0x296   :  { %v924_v50 = vpack.c.bf16 %v923_v49, %v923_v49  ;;  %v1791_v49 = vcombine.high %v1013_v44, %v1017_v45 }
 0x298   :  { %1965 = vmatmul.mubr.msk.bf16.vlgmr.msra.gmra.mrb[8].mxu1 %vm948_vm2, %v924_v50  ;;  %v1020_v50 = vld [vmem:[#allocation4 + $0xd0] sm:$0xff] }
 0x299   :  { %1421 = vmatpush1.bf16.msra.mxu1 %v1768_v7  ;;  %v1817_v7 = vcombine.high %v1042_v4, %v1046_v5  ;;  %1452 = vmatprep.mubr.bf16.mxu1 %v2145_v20  ;;  %v1037_v4 = vld [vmem:[#allocation4 + $0x158] sm:$0xff] }
 0x29a   :  { %1422 = vmatprep.subr.bf16.mxu1 %v1777_v51  ;;  %v1024_v51 = vld [vmem:[#allocation4 + $0xf0] sm:$0xff]  ;;  %v1041_v5 = vld [vmem:[#allocation4 + $0x178] sm:$0xff] }
 0x29b   :  { %v1797_v56 = vcombine.high %v1020_v50, %v1024_v51  ;;  %v1815_v9 = vcombine.high %v1037_v4, %v1041_v5  ;;  %v1814_v15 = vcombine.low %v1037_v4, %v1041_v5 }
 0x29d   :  { %1423 = vmatpush1.bf16.msra.mxu1 %v1776_v54  ;;  %v1788_v54 = vcombine.low %v1012_v42, %v1016_v43 }
 0x29e   :  { %1424 = vmatprep.subr.bf16.mxu1 %v1785_v55  ;;  %v1790_v55 = vcombine.low %v1013_v44, %v1017_v45 }
 0x2a1   :  { %1425 = vmatpush1.bf16.msra.mxu1 %v1784_v58  ;;  %v1028_v58 = vld [vmem:[#allocation4 + $0x110] sm:$0xff] }
 0x2a2   :  { %1426 = vmatprep.subr.bf16.mxu1 %v1793_v59  ;;  %v1032_v59 = vld [vmem:[#allocation4 + $0x130] sm:$0xff] }
 0x2a3   :  { %v1805_v0 = vcombine.high %v1028_v58, %v1032_v59 }
 0x2a5   :  { %1427 = vmatpush1.bf16.msra.mxu1 %v1792_v62  ;;  %v1796_v62 = vcombine.low %v1020_v50, %v1024_v51 }
 0x2a6   :  { %1428 = vmatprep.subr.bf16.mxu1 %v1801_v63  ;;  %v1798_v63 = vcombine.low %v1021_v52, %v1025_v53 }
 0x2a9   :  { %1429 = vmatpush1.bf16.msra.mxu1 %v1800_v2  ;;  %v1036_v2 = vld [vmem:[#allocation4 + $0x150] sm:$0xff] }
 0x2aa   :  { %1430 = vmatprep.subr.bf16.mxu1 %v1809_v3  ;;  %v1040_v3 = vld [vmem:[#allocation4 + $0x170] sm:$0xff] }
 0x2ad   :  { %1431 = vmatpush1.bf16.msra.mxu1 %v1808_v6  ;;  %v1804_v6 = vcombine.low %v1028_v58, %v1032_v59 }
 0x2ae   :  { %1432 = vmatprep.subr.bf16.mxu1 %v1817_v7  ;;  %v1806_v7 = vcombine.low %v1029_v60, %v1033_v61 }
 0x2b1   :  { %1433 = vmatpush1.bf16.msra.mxu1 %v1816_v8  ;;  %v1813_v8 = vcombine.high %v1036_v2, %v1040_v3 }
 0x2b2   :  { %1434 = vmatprep.subr.bf16.mxu1 %v1825_v12  ;;  %v1045_v12 = vld [vmem:[#allocation4 + $0x198] sm:$0xff] }
 0x2b3   :  { %v1823_v17 = vcombine.high %v1045_v12, %v1049_v13  ;;  %v1822_v23 = vcombine.low %v1045_v12, %v1049_v13 }
 0x2b5   :  { %1435 = vmatpush1.bf16.msra.mxu1 %v1824_v14  ;;  %v1812_v14 = vcombine.low %v1036_v2, %v1040_v3  ;;  %v1090_v2 = vsub.s32 7, %v2231_v30 }
 0x2b6   :  { %1502 = vmatprep.subr.bf16.mxu1 %v1773_v22  ;;  %v1820_v22 = vcombine.low %v1044_v10, %v1048_v11 }
 0x36b   :  { %v986_v27 = vpop.f32.mrb[8].mxu1 }
 0x36c   :  { %v987_v28 = vadd.f32 %v1764_v26, %v986_v27  ;;  %v1966_v29 = vpop.f32.mrb[9].mxu1  ;;  %v1828_v26 = vcombine.low %v1052_v18, %v1056_v19 }
 0x36d   :  { %v989_v32 = vpop.f32.mrb[10].mxu1  ;;  %v1070_v29 = vsub.s32 2, %v2231_v30 }
 0x36e   :  { %v992_v37 = vmax.f32 %v987_v28, 0.0  ;;  %v1967_v38 = vpop.f32.mrb[11].mxu1  ;;  %v1062_v28 = vsub.s32 0, %v2231_v30  ;;  %v1066_v32 = vsub.s32 1, %v2231_v30 }
 0x36f   :  { %v1071_v36 = vrot.slane %v1058_v31, %v1070_v29  ;;  %v1075_v38 = vrot.slane %v1058_v31, %v1074_v33 }
 0x370   :  { %v2303_v39 = vpack.c.bf16 %v992_v37, %v992_v37  ;;  %v1063_v34 = vrot.slane %v1058_v31, %v1062_v28  ;;  %v1067_v37 = vrot.slane %v1058_v31, %v1066_v32 }
 0x372   :  { %1453 = vmatmul.mubr.bf16.vlgmr.msra.gmra.mrb[12].mxu1 %v2303_v39  ;;  %1494 = vmatmul.mubr.bf16.vlgmr.msra.gmra.mrb[12].mxu0 %v2303_v39 }
 0x373   :  { %1503 = vmatpush1.bf16.msra.mxu1 %v1772_v21  ;;  %1544 = vmatpush1.bf16.msra.mxu0 %v1774_v24  ;;  %v1057_v21 = vld [vmem:[#allocation4 + $0x1f8] sm:$0xff]  ;;  %v1829_v24 = vcombine.high %v1052_v18, %v1056_v19 }
 0x374   :  { %1504 = vmatprep.subr.bf16.mxu1 %v1781_v40  ;;  %1545 = vmatprep.subr.bf16.mxu0 %v1783_v41 }
 0x375   :  { %1534 = vmatprep.mubr.bf16.mxu1 %v2145_v20  ;;  %1575 = vmatprep.mubr.bf16.mxu0 %v2145_v20  ;;  %v1053_v20 = vld [vmem:[#allocation4 + $0x1d8] sm:$0xff] }
 0x376   :  { %v1831_v25 = vcombine.high %v1053_v20, %v1057_v21  ;;  %v1830_v27 = vcombine.low %v1053_v20, %v1057_v21 }
 0x377   :  { %1505 = vmatpush1.bf16.msra.mxu1 %v1780_v46  ;;  %1546 = vmatpush1.bf16.msra.mxu0 %v1782_v47 }
 0x378   :  { %1506 = vmatprep.subr.bf16.mxu1 %v1789_v48  ;;  %1547 = vmatprep.subr.bf16.mxu0 %v1791_v49 }
 0x37b   :  { %1507 = vmatpush1.bf16.msra.mxu1 %v1788_v54  ;;  %1548 = vmatpush1.bf16.msra.mxu0 %v1790_v55 }
 0x37c   :  { %1508 = vmatprep.subr.bf16.mxu1 %v1797_v56  ;;  %1549 = vmatprep.subr.bf16.mxu0 %v1799_v57 }
 0x37f   :  { %1509 = vmatpush1.bf16.msra.mxu1 %v1796_v62  ;;  %1550 = vmatpush1.bf16.msra.mxu0 %v1798_v63  ;;  %v1078_v63 = vsub.s32 4, %v2231_v30 }
 0x380   :  { %1510 = vmatprep.subr.bf16.mxu1 %v1805_v0  ;;  %1551 = vmatprep.subr.bf16.mxu0 %v1807_v1  ;;  %v1086_v0 = vsub.s32 6, %v2231_v30  ;;  %v1082_v1 = vsub.s32 5, %v2231_v30 }
 0x381   :  { %v1079_v5 = vrot.slane %v1058_v31, %v1078_v63 }
 0x383   :  { %1511 = vmatpush1.bf16.msra.mxu1 %v1804_v6  ;;  %1552 = vmatpush1.bf16.msra.mxu0 %v1806_v7  ;;  %v1087_v6 = vrot.slane %v1058_v31, %v1086_v0 }
 0x384   :  { %1512 = vmatprep.subr.bf16.mxu1 %v1813_v8  ;;  %1553 = vmatprep.subr.bf16.mxu0 %v1815_v9  ;;  %v1083_v8 = vrot.slane %v1058_v31, %v1082_v1  ;;  %v1091_v9 = vrot.slane %v1058_v31, %v1090_v2 }
 0x387   :  { %1513 = vmatpush1.bf16.msra.mxu1 %v1812_v14  ;;  %1554 = vmatpush1.bf16.msra.mxu0 %v1814_v15 }
 0x388   :  { %1514 = vmatprep.subr.bf16.mxu1 %v1821_v16  ;;  %1555 = vmatprep.subr.bf16.mxu0 %v1823_v17 }
 0x38b   :  { %1515 = vmatpush1.bf16.msra.mxu1 %v1820_v22  ;;  %1556 = vmatpush1.bf16.msra.mxu0 %v1822_v23 }
 0x38c   :  { %1516 = vmatprep.subr.bf16.mxu1 %v1829_v24  ;;  %1557 = vmatprep.subr.bf16.mxu0 %v1831_v25 }
 0x38f   :  { %1517 = vmatpush1.bf16.msra.mxu1 %v1828_v26  ;;  %1558 = vmatpush1.bf16.msra.mxu0 %v1830_v27 }
 0x392   :  { %1535 = vmatmul.mubr.bf16.vlgmr.msra.gmra.mrb[16].mxu1 %v2303_v39  ;;  %1576 = vmatmul.mubr.bf16.vlgmr.msra.gmra.mrb[16].mxu0 %v2303_v39 }
 0x445   :  { %v1454_v40 = vpop.f32.mrb[12].mxu1  ;;  %v1495_v41 = vpop.f32.mrb[12].mxu0 }
 0x446   :  { %v1455_v42 = vadd.f32 %v1454_v40, %v1063_v34  ;;  %v1496_v39 = vadd.f32 %v1495_v41, %v1071_v36  ;;  %v1456_v43 = vpop.f32.mrb[13].mxu1  ;;  %v1497_v44 = vpop.f32.mrb[13].mxu0 }
 0x447   :  { %v1457_v45 = vadd.f32 %v1456_v43, %v1067_v37  ;;  %v1498_v46 = vadd.f32 %v1497_v44, %v1075_v38  ;;  %v1458_v47 = vpop.f32.mrb[14].mxu1  ;;  %v1499_v48 = vpop.f32.mrb[14].mxu0 }
 0x448   :  { %v1832_v49 = vmul.f32 -1.442695, %v1455_v42  ;;  %v1834_v50 = vmul.f32 -1.442695, %v1496_v39  ;;  %v1459_v51 = vpop.f32.mrb[15].mxu1  ;;  %v1500_v52 = vpop.f32.mrb[15].mxu0 }
 0x449   :  { %v1833_v53 = vmul.f32 -1.442695, %v1457_v45  ;;  %v1835_v54 = vmul.f32 -1.442695, %v1498_v46 }
 0x44a   :  { %2055 = vpow2.f32 %v1832_v49 }
 0x44b   :  { %2057 = vpow2.f32 %v1834_v50 }
 0x44c   :  { %2059 = vpow2.f32 %v1833_v53 }
 0x44d   :  { %2061 = vpow2.f32 %v1835_v54 }
 0x454   :  { %v2056_v55 = vpop.eup %2055 }
 0x455   :  { %v2058_v56 = vpop.eup %2057  ;;  %v1608_v57 = vadd.f32 1.0, %v2056_v55 }
 0x456   :  { %v2060_v58 = vpop.eup %2059  ;;  %v1610_v59 = vadd.f32 1.0, %v2058_v56 }
 0x457   :  { %v2062_v60 = vpop.eup %2061  ;;  %2063 = vrcp.f32 %v1608_v57  ;;  %v1609_v61 = vadd.f32 1.0, %v2060_v58 }
 0x458   :  { %2065 = vrcp.f32 %v1610_v59  ;;  %v1611_v62 = vadd.f32 1.0, %v2062_v60 }
 0x459   :  { %2067 = vrcp.f32 %v1609_v61 }
 0x45a   :  { %2069 = vrcp.f32 %v1611_v62 }
 0x461   :  { %v2064_v3 = vpop.eup %2063 }
 0x462   :  { %v2066_v4 = vpop.eup %2065 }
 0x463   :  { %v2068_v7 = vpop.eup %2067 }
 0x464   :  { %v2070_v10 = vpop.eup %2069  ;;  %v1640_v11 = vcombine.low %v2064_v3, %v2068_v7 }
 0x465   :  { %v1641_v12 = vcombine.low %v2066_v4, %v2070_v10  ;;  %v1536_v13 = vpop.f32.mrb[16].mxu1  ;;  %v1577_v14 = vpop.f32.mrb[16].mxu0 }
 0x466   :  { %v1648_v15 = vrot.slane %v1640_v11, %v2234_v35  ;;  %v1537_v16 = vadd.f32 %v1536_v13, %v1079_v5  ;;  %v1578_v17 = vadd.f32 %v1577_v14, %v1087_v6  ;;  %v1538_v18 = vpop.f32.mrb[17].mxu1  ;;  %v1579_v19 = vpop.f32.mrb[17].mxu0 }
 0x467   :  { %v1655_v30 = vrot.slane %v1641_v12, %v2234_v35  ;;  %v1539_v20 = vadd.f32 %v1538_v18, %v1083_v8  ;;  %v1580_v21 = vadd.f32 %v1579_v19, %v1091_v9  ;;  %v1540_v22 = vpop.f32.mrb[18].mxu1  ;;  %v1581_v23 = vpop.f32.mrb[18].mxu0 }
 0x468   :  { %v1836_v24 = vmul.f32 -1.442695, %v1537_v16  ;;  %v1838_v25 = vmul.f32 -1.442695, %v1578_v17  ;;  %v1541_v26 = vpop.f32.mrb[19].mxu1  ;;  %v1582_v27 = vpop.f32.mrb[19].mxu0 }
 0x469   :  { %v1656_v28 = vcombine.low %v1648_v15, %v1655_v30  ;;  %v1837_v29 = vmul.f32 -1.442695, %v1539_v20  ;;  %v1839_v31 = vmul.f32 -1.442695, %v1580_v21 }
 0x46a   :  { %2071 = vpow2.f32 %v1836_v24 }
 0x46b   :  { %1676 = vst [vmem:[%s2340_s10] sm:$0xff] %v1656_v28  ;;  %2073 = vpow2.f32 %v1838_v25 }
 0x46c   :  { %2075 = vpow2.f32 %v1837_v29 }
 0x46d   :  { %2077 = vpow2.f32 %v1839_v31 }
 0x474   :  { %v2072_v32 = vpop.eup %2071 }
 0x475   :  { %v2074_v33 = vpop.eup %2073  ;;  %v1612_v34 = vadd.f32 1.0, %v2072_v32 }
 0x476   :  { %v2076_v36 = vpop.eup %2075  ;;  %v1614_v37 = vadd.f32 1.0, %v2074_v33 }
 0x477   :  { %v2078_v38 = vpop.eup %2077  ;;  %2079 = vrcp.f32 %v1612_v34  ;;  %v1613_v40 = vadd.f32 1.0, %v2076_v36 }
 0x478   :  { %2081 = vrcp.f32 %v1614_v37  ;;  %v1615_v41 = vadd.f32 1.0, %v2078_v38 }
 0x479   :  { %2083 = vrcp.f32 %v1613_v40 }
 0x47a   :  { %2085 = vrcp.f32 %v1615_v41 }
 0x481   :  { %v2080_v42 = vpop.eup %2079 }
 0x482   :  { %v2082_v39 = vpop.eup %2081 }
 0x483   :  { %v2084_v43 = vpop.eup %2083 }
 0x484   :  { %v2086_v44 = vpop.eup %2085  ;;  %v1657_v45 = vcombine.low %v2080_v42, %v2084_v43 }
 0x485   :  { %v1658_v46 = vcombine.low %v2082_v39, %v2086_v44 }
 0x486   :  { %v1665_v47 = vrot.slane %v1657_v45, %v2234_v35 }
 0x487   :  { %v1672_v48 = vrot.slane %v1658_v46, %v2234_v35 }
 0x489   :  { %v1673_v49 = vcombine.low %v1665_v47, %v1672_v48 }
 0x48b   :  { %1677 = vst [vmem:[%s2340_s10 + $0x8] sm:$0xff] %v1673_v49 }
 0x48c   :  { %1688 = vsyncpa [#allocation3], 1 }
 0x48d   :  { %1689 = vsyncpa [#allocation5], 1 }

</bundles_post_ra>
